<compile_context>
chip_gen: v5e
topology: v5e:2x2
jax: 0.10.0
libtpu: 0.0.40
codegen_flags: <defaults>
</compile_context>

<pallas_src>
import functools

import jax
import jax.numpy as jnp
from jax.experimental import pallas as pl
from jax.experimental.pallas import tpu as pltpu


_VMEM_LIMIT_BYTES = 32 * 1024 * 1024     # scoped VMEM limit; safe on v5e/v6e/v7x
_FUSED_BUDGET_BYTES = 24 * 1024 * 1024   # fused-path plan: 2x-buffered in/out + f32 temps
_STREAM_TILE_BYTES = 4 * 1024 * 1024     # target x-block bytes for the streaming passes

_SUBLANES = {4: 8, 2: 16, 1: 32}         # sublane granule per itemsize (f32/bf16/int8)


def _cdiv(a, b):
    return (a + b - 1) // b


# --------------------------- fused single-read path ---------------------------
def _fused_kernel(x_ref, gamma_ref, beta_ref, o_ref, *, inv_n, eps):
    # x_ref: (N, tc) resident channel strip; gamma/beta: (1, tc) f32.
    x = x_ref[...].astype(jnp.float32)
    mean = jnp.sum(x, axis=0, keepdims=True) * inv_n
    xc = x - mean                                           # centered -> stable variance
    var = jnp.sum(xc * xc, axis=0, keepdims=True) * inv_n   # biased (unbiased=False)
    inv_std = jax.lax.rsqrt(var + eps)
    o_ref[...] = (xc * (gamma_ref[...] * inv_std) + beta_ref[...]).astype(o_ref.dtype)


# ------------------------ streaming two-pass fallback -------------------------
def _stats_kernel(x_ref, sum_ref, sq_ref, *, tn, n_rows, n_sub, need_mask):
    # x_ref: (tn, tc).  sum_ref / sq_ref: (8, tc) f32 accumulators (row 0 is the
    # live accumulator, rows 1..7 are zero padding for sublane alignment) that
    # stay resident across the reduction (last) grid axis.
    k = pl.program_id(2)

    @pl.when(k == 0)
    def _init():
        sum_ref[...] = jnp.zeros_like(sum_ref)
        sq_ref[...] = jnp.zeros_like(sq_ref)

    x = x_ref[...].astype(jnp.float32)
    if need_mask:
        # Zero rows past the true row count: the partial last tile and the
        # duplicated (clamped) tile of an odd N-split contribute nothing.
        s = pl.program_id(0)
        row0 = (s * n_sub + k) * tn
        rows = jax.lax.broadcasted_iota(jnp.int32, x.shape, 0) + row0
        x = jnp.where(rows < n_rows, x, 0.0)

    sum_ref[0:1, :] += jnp.sum(x, axis=0, keepdims=True)
    sq_ref[0:1, :] += jnp.sum(x * x, axis=0, keepdims=True)


def _norm_kernel(x_ref, sum_ref, sq_ref, gamma_ref, beta_ref, o_ref, *, inv_n, eps):
    # Per-channel affine math folded into the kernel (no XLA glue between the
    # two pallas_calls).  Summing the accumulator rows combines the N-split
    # partials (padding rows are zero).
    total = jnp.sum(sum_ref[...], axis=0, keepdims=True)
    total_sq = jnp.sum(sq_ref[...], axis=0, keepdims=True)
    mean = total * inv_n
    # f32 raw-moment variance (standard for streaming BN); clamp tiny negatives.
    var = jnp.maximum(total_sq * inv_n - mean * mean, 0.0)
    inv_std = jax.lax.rsqrt(var + eps)
    scale = gamma_ref[...] * inv_std
    shift = beta_ref[...] - mean * scale
    o_ref[...] = (x_ref[...].astype(jnp.float32) * scale + shift).astype(o_ref.dtype)


def batchnorm_forward(x, gamma, beta, *, eps=1e-5,
                      _force_two_pass=False, _force_tn=None):
    """Training-mode BatchNorm forward for x of shape (B, L, C)."""
    B, L, C = x.shape
    N = B * L
    x2d = x.reshape(N, C)

    isz = x.dtype.itemsize
    sub = _SUBLANES.get(isz, 8)
    inv_n = 1.0 / float(N)
    eps = float(eps)

    gamma2 = gamma.astype(jnp.float32).reshape(1, C)
    beta2 = beta.astype(jnp.float32).reshape(1, C)

    # TODO(synk): running_mean / running_var momentum updates are module state
    # (side effects) in the PyTorch module and are not produced here.

    # ---------------- fused single-read path ----------------
    def fused_bytes(tc):
        # double-buffered x block + double-buffered out block + ~2 f32 temps
        return N * tc * (2 * isz + 2 * isz + 2 * 4) + 8 * tc * 4

    tc_fused = None
    if not _force_two_pass:
        cands = [C]                          # full width: always legal, fully contiguous
        w = (C // 128) * 128
        while w >= 128:
            if w < C:
                cands.append(w)              # lane-aligned fractions (partial last block OK)
            w = ((w // 2) // 128) * 128
        fitting = [w for w in cands if fused_bytes(w) <= _FUSED_BUDGET_BYTES]
        if fitting:
            tc_fused = fitting[0]
            # Give the v7x megacore >= 2 channel steps, but only if each row
            # chunk stays >= 2 KiB contiguous (keeps HBM bursts long).
            for w in fitting:
                if w < C and w * isz >= 2048:
                    tc_fused = w
                    break

    if tc_fused is not None:
        c_steps = _cdiv(C, tc_fused)
        out2d = pl.pallas_call(
            functools.partial(_fused_kernel, inv_n=inv_n, eps=eps),
            out_shape=jax.ShapeDtypeStruct((N, C), x.dtype),
            grid_spec=pltpu.PrefetchScalarGridSpec(
                num_scalar_prefetch=0,
                grid=(c_steps,),
                in_specs=[
                    pl.BlockSpec((N, tc_fused), lambda j: (0, j)),
                    pl.BlockSpec((1, tc_fused), lambda j: (0, j)),
                    pl.BlockSpec((1, tc_fused), lambda j: (0, j)),
                ],
                out_specs=pl.BlockSpec((N, tc_fused), lambda j: (0, j)),
            ),
            compiler_params=pltpu.CompilerParams(
                dimension_semantics=("parallel",),
                vmem_limit_bytes=_VMEM_LIMIT_BYTES,
            ),
        )(x2d, gamma2, beta2)
        return out2d.reshape(B, L, C)

    # ---------------- streaming two-pass path (large N) ----------------
    # Channel tile: full width (fully contiguous rows).  Only split if even a
    # minimal-height full-width tile would blow the VMEM budget (huge C).
    tc = C
    while tc > 128 and sub * tc * isz > (1 << 20):
        tc = max(128, ((tc // 2) // 128) * 128)
    c_steps = _cdiv(C, tc)
    c_round = c_steps * tc

    if _force_tn is not None:
        tn = int(_force_tn)
    else:
        tn = max(sub, (_STREAM_TILE_BYTES // (tc * isz)) // sub * sub)
    if tn >= N:
        tn = N
    n_blocks = _cdiv(N, tn)

    # Split the N reduction into two "parallel" partial accumulators so both
    # v7x TensorCores get pass-1 work even when c_steps == 1.
    n_split = 2 if n_blocks >= 2 else 1
    n_sub = _cdiv(n_blocks, n_split)
    need_mask = (N % tn != 0) or (n_split * n_sub != n_blocks)

    acc_shape = jax.ShapeDtypeStruct((8 * n_split, c_round), jnp.float32)
    sums, sqs = pl.pallas_call(
        functools.partial(_stats_kernel, tn=tn, n_rows=N, n_sub=n_sub,
                          need_mask=need_mask),
        out_shape=(acc_shape, acc_shape),
        grid_spec=pltpu.PrefetchScalarGridSpec(
            num_scalar_prefetch=0,
            grid=(n_split, c_steps, n_sub),
            in_specs=[pl.BlockSpec(
                (tn, tc),
                lambda s, j, k: (jnp.minimum(s * n_sub + k, n_blocks - 1), j))],
            out_specs=(
                pl.BlockSpec((8, tc), lambda s, j, k: (s, j)),
                pl.BlockSpec((8, tc), lambda s, j, k: (s, j)),
            ),
        ),
        compiler_params=pltpu.CompilerParams(
            dimension_semantics=("parallel", "parallel", "arbitrary"),
            vmem_limit_bytes=_VMEM_LIMIT_BYTES,
        ),
    )(x2d)

    out2d = pl.pallas_call(
        functools.partial(_norm_kernel, inv_n=inv_n, eps=eps),
        out_shape=jax.ShapeDtypeStruct((N, C), x.dtype),
        grid_spec=pltpu.PrefetchScalarGridSpec(
            num_scalar_prefetch=0,
            grid=(n_blocks, c_steps),        # bigger axis leading -> megacore balance
            in_specs=[
                pl.BlockSpec((tn, tc), lambda i, j: (i, j)),
                pl.BlockSpec((8 * n_split, tc), lambda i, j: (0, j)),
                pl.BlockSpec((8 * n_split, tc), lambda i, j: (0, j)),
                pl.BlockSpec((1, tc), lambda i, j: (0, j)),
                pl.BlockSpec((1, tc), lambda i, j: (0, j)),
            ],
            out_specs=pl.BlockSpec((tn, tc), lambda i, j: (i, j)),
        ),
        compiler_params=pltpu.CompilerParams(
            dimension_semantics=("parallel", "parallel"),
            vmem_limit_bytes=_VMEM_LIMIT_BYTES,
        ),
    )(x2d, sums, sqs, gamma2, beta2)
    return out2d.reshape(B, L, C)


def batchnorm_reference(x, gamma, beta, *, eps=1e-5):
    mean = jnp.mean(x, axis=(0, 1), keepdims=True)
    var = jnp.mean((x - mean) ** 2, axis=(0, 1), keepdims=True)  # unbiased=False
    x_hat = (x - mean) / jnp.sqrt(var + eps)
    return gamma.reshape(1, 1, -1) * x_hat + beta.reshape(1, 1, -1)


if __name__ == "__main__":
    key = jax.random.PRNGKey(0)
    kx, kg, kb, kx2 = jax.random.split(key, 4)

    # Small shape consistent with the (batch, seq, channel) convention.
    B, L, C = 2, 8, 256
    x = 0.5 + jax.random.normal(kx, (B, L, C), dtype=jnp.float32)
    gamma = jnp.ones((C,), jnp.float32) + 0.1 * jax.random.normal(kg, (C,), jnp.float32)
    beta = 0.1 * jax.random.normal(kb, (C,), jnp.float32)

    out = jax.block_until_ready(batchnorm_forward(x, gamma, beta, eps=1e-5))
    ref = batchnorm_reference(x, gamma, beta, eps=1e-5)
    assert out.shape == (B, L, C)
    assert jnp.allclose(out, ref, atol=2e-5, rtol=2e-5), "fused path mismatch"

    # Also exercise the streaming two-pass path (masked partial row tiles and
    # the clamped N-split partial accumulators) by forcing its tiling knobs.
    B2, L2, C2 = 2, 50, 256
    x2 = 1.3 + 0.7 * jax.random.normal(kx2, (B2, L2, C2), dtype=jnp.float32)
    g2 = jnp.ones((C2,), jnp.float32)
    b2 = jnp.zeros((C2,), jnp.float32)
    out2 = jax.block_until_ready(
        batchnorm_forward(x2, g2, b2, eps=1e-5, _force_two_pass=True, _force_tn=16))
    ref2 = batchnorm_reference(x2, g2, b2, eps=1e-5)
    assert jnp.allclose(out2, ref2, atol=1e-4, rtol=1e-4), "two-pass path mismatch"

    print("KERNEL_OK")
</pallas_src>

<mosaic_0001>
module attributes {stable_mosaic.version = 11 : i64} {
  func.func @_fused_kernel(%arg0: i32, %arg1: memref<16x256xf32, #tpu.memory_space<vmem>>, %arg2: memref<1x256xf32, #tpu.memory_space<vmem>>, %arg3: memref<1x256xf32, #tpu.memory_space<vmem>>, %arg4: memref<16x256xf32, #tpu.memory_space<vmem>>) attributes {dimension_semantics = [#tpu.dimension_semantics<parallel>], iteration_bounds = array<i64: 1>, scalar_prefetch = 0 : i64, scratch_operands = 0 : i64, tpu.core_type = #tpu.core_type<tc>, window_params = [{transform_indices = @transform_0, window_bounds = array<i64: 16, 256>}, {transform_indices = @transform_1, window_bounds = array<i64: 1, 256>}, {transform_indices = @transform_2, window_bounds = array<i64: 1, 256>}, {transform_indices = @transform_3, window_bounds = array<i64: 16, 256>}]} {
    %c0 = arith.constant 0 : index
    %c0_0 = arith.constant 0 : index
    %0 = vector.load %arg1[%c0, %c0_0] : memref<16x256xf32, #tpu.memory_space<vmem>>, vector<16x256xf32>
    %cst = arith.constant dense<0.000000e+00> : vector<256xf32>
    %1 = vector.multi_reduction <add>, %0, %cst [0] : vector<16x256xf32> to vector<256xf32>
    %2 = vector.shape_cast %1 : vector<256xf32> to vector<1x256xf32>
    %cst_1 = arith.constant 6.250000e-02 : f32
    %3 = vector.broadcast %cst_1 : f32 to vector<1x256xf32>
    %4 = arith.mulf %2, %3 : vector<1x256xf32>
    %5 = vector.broadcast %4 : vector<1x256xf32> to vector<16x256xf32>
    %6 = arith.subf %0, %5 : vector<16x256xf32>
    %7 = arith.mulf %6, %6 : vector<16x256xf32>
    %cst_2 = arith.constant dense<0.000000e+00> : vector<256xf32>
    %8 = vector.multi_reduction <add>, %7, %cst_2 [0] : vector<16x256xf32> to vector<256xf32>
    %9 = vector.shape_cast %8 : vector<256xf32> to vector<1x256xf32>
    %cst_3 = arith.constant 6.250000e-02 : f32
    %10 = vector.broadcast %cst_3 : f32 to vector<1x256xf32>
    %11 = arith.mulf %9, %10 : vector<1x256xf32>
    %cst_4 = arith.constant 9.99999974E-6 : f32
    %12 = vector.broadcast %cst_4 : f32 to vector<1x256xf32>
    %13 = arith.addf %11, %12 : vector<1x256xf32>
    %14 = math.rsqrt %13 : vector<1x256xf32>
    %c0_5 = arith.constant 0 : index
    %c0_6 = arith.constant 0 : index
    %15 = vector.load %arg2[%c0_5, %c0_6] : memref<1x256xf32, #tpu.memory_space<vmem>>, vector<1x256xf32>
    %16 = arith.mulf %15, %14 : vector<1x256xf32>
    %17 = vector.broadcast %16 : vector<1x256xf32> to vector<16x256xf32>
    %18 = arith.mulf %6, %17 : vector<16x256xf32>
    %c0_7 = arith.constant 0 : index
    %c0_8 = arith.constant 0 : index
    %19 = vector.load %arg3[%c0_7, %c0_8] : memref<1x256xf32, #tpu.memory_space<vmem>>, vector<1x256xf32>
    %20 = vector.broadcast %19 : vector<1x256xf32> to vector<16x256xf32>
    %21 = arith.addf %18, %20 : vector<16x256xf32>
    %c0_9 = arith.constant 0 : index
    %c0_10 = arith.constant 0 : index
    %22 = vector.load %arg4[%c0_9, %c0_10] : memref<16x256xf32, #tpu.memory_space<vmem>>, vector<16x256xf32>
    tpu.vector_store %arg4[%c0_9, %c0_10], %21 {strides = array<i32>} : memref<16x256xf32, #tpu.memory_space<vmem>>, vector<16x256xf32>,
    return
  }
  func.func @transform_0(%arg0: i32) -> (i32, i32) {
    %c0_i32 = arith.constant 0 : i32
    %c0_i32_0 = arith.constant 0 : i32
    return %c0_i32, %arg0 : i32, i32
  }
  func.func @transform_1(%arg0: i32) -> (i32, i32) {
    %c0_i32 = arith.constant 0 : i32
    %c0_i32_0 = arith.constant 0 : i32
    return %c0_i32, %arg0 : i32, i32
  }
  func.func @transform_2(%arg0: i32) -> (i32, i32) {
    %c0_i32 = arith.constant 0 : i32
    %c0_i32_0 = arith.constant 0 : i32
    return %c0_i32, %arg0 : i32, i32
  }
  func.func @transform_3(%arg0: i32) -> (i32, i32) {
    %c0_i32 = arith.constant 0 : i32
    %c0_i32_0 = arith.constant 0 : i32
    return %c0_i32, %arg0 : i32, i32
  }
}

</mosaic_0001>

<bundles_post_ra>
// kernel: tpu_custom_call.1
= control target key start
LH: loop header
LB: loop body
LE: loop exit
PB: predicated region body
PF: predicated region fallthrough
CT: control target
= control target key end

     0   :  { %8 = vsyncpa [#allocation3], 0  ;;  %s331_s0 = inlined_call_operand.hbm [shape: f32[16,256], index: 0, kind: input, shape index: {}]   ;;  %s332_s1 = inlined_call_operand.hbm [shape: f32[1,256], index: 1, kind: input, shape index: {}]   ;;  %s333_s2 = inlined_call_operand.hbm [shape: f32[1,256], index: 2, kind: input, shape index: {}]   ;;  %s334_s3 = inlined_call_operand.hbm [shape: f32[16,256], index: 3, kind: output, shape index: {}]  }
   0x1   :  { %9 = vsyncpa [#allocation6], 0  ;;  %s29_s14 = sshll.u32 %s332_s1, 4  ;;  %s30_s14 = int_to_ptr.hbm [resolvable:$true] %s29_s14 }
   0x2   :  { %10 = vsyncpa [#allocation4], 0  ;;  %s287_s15 = smov [#allocation5]   ;;  %s15_s19 = sshll.u32 %s331_s0, 4  ;;  %s16_s19 = int_to_ptr.hbm [resolvable:$true] %s15_s19 }
   0x3   :  { %s31_s16 = sshll.u32 %s287_s15, 4  ;;  %s288_s20 = smov [#allocation2]   ;;  %s32_s16 = int_to_ptr.vmem [resolvable:$true] %s31_s16 }
   0x4   :  { %34 = dma.hbm_to_vmem [thread:$0]  %s30_s14, 32, %s32_s16, [#allocation6]  }
   0x5   :  { %s17_s21 = sshll.u32 %s288_s20, 4  ;;  %s289_s22 = smov 256   ;;  %s18_s21 = int_to_ptr.vmem [resolvable:$true] %s17_s21 }
   0x6   :  { %s290_s23 = smov 16   ;;  %s40_s25 = sshll.u32 %s333_s2, 4  ;;  %s41_s25 = int_to_ptr.hbm [resolvable:$true] %s40_s25 }
   0x7   :  { %23 = dma.hbm_to_vmem [thread:$0]  %s16_s19, 512, %s18_s21, [#allocation3], %s289_s22, %s289_s22, %s290_s23  }
   0x8   :  { %s291_s26 = smov [#allocation7]  }
   0x9   :  { %s42_s27 = sshll.u32 %s291_s26, 4  ;;  %s43_s27 = int_to_ptr.vmem [resolvable:$true] %s42_s27 }
   0xa   :  { %45 = dma.hbm_to_vmem [thread:$0]  %s41_s25, 32, %s43_s27, [#allocation6]  }
   0xb   :  { %281 = dma.done.wait [#allocation3], 512  }
   0xc   :  { %282 = vsyncadd [#allocation3], 4294966784 }
   0xd   :  { %283 = dma.done.wait [#allocation6], 64  }
   0xe   :  { %284 = vsyncadd [#allocation6], 4294967232  ;;  %v58_v0 = vld [vmem:[#allocation2] sm:$0xff]  ;;  %v59_v1 = vld [vmem:[#allocation2 + $0x8] sm:$0xff]  ;;  %vm128_vm6 = vcmask 1040384   ;;  %s292_s0 = smov [#allocation8]  }
   0xf   :  { %v60_v2 = vld [vmem:[#allocation2 + $0x10] sm:$0xff]  ;;  %v61_v3 = vld [vmem:[#allocation2 + $0x18] sm:$0xff]  ;;  %v124_v60 = vld [vmem:[#allocation5] sm:$0x3]  ;;  %s159_s2 = sshll.u32 %s292_s0, 4  ;;  %s161_s30 = sshll.u32 %s334_s3, 4  ;;  %s160_s2 = int_to_ptr.vmem [resolvable:$true] %s159_s2  ;;  %s162_s30 = int_to_ptr.hbm [resolvable:$true] %s161_s30 }
  0x10   :  { %v62_v4 = vadd.f32 %v60_v2, %v58_v0  ;;  %v69_v5 = vadd.f32 %v61_v3, %v59_v1  ;;  %v141_v63 = vld [vmem:[#allocation7] sm:$0x3] }
  0x12   :  { %v63_v6 = vrot.slane %v62_v4, 4  ;;  %v70_v7 = vrot.slane %v69_v5, 4 }
  0x14   :  { %v64_v8 = vadd.f32 %v63_v6, %v62_v4  ;;  %v71_v9 = vadd.f32 %v70_v7, %v69_v5  ;;  %v144_v4 = vperm.slane %v141_v63, 1 }
  0x16   :  { %v65_v10 = vrot.slane %v64_v8, 2  ;;  %v72_v11 = vrot.slane %v71_v9, 2 }
  0x18   :  { %v66_v12 = vadd.f32 %v65_v10, %v64_v8  ;;  %v73_v13 = vadd.f32 %v72_v11, %v71_v9 }
  0x1a   :  { %v67_v14 = vrot.slane %v66_v12, 1  ;;  %v74_v15 = vrot.slane %v73_v13, 1 }
  0x1c   :  { %v68_v16 = vadd.f32 %v67_v14, %v66_v12  ;;  %v75_v17 = vadd.f32 %v74_v15, %v73_v13 }
  0x1e   :  { %v76_v18 = vmul.f32 0.0625, %v68_v16  ;;  %v77_v19 = vmul.f32 0.0625, %v75_v17 }
  0x20   :  { %v78_v20 = vsub.f32 %v58_v0, %v76_v18  ;;  %v80_v21 = vsub.f32 %v60_v2, %v76_v18  ;;  %v79_v22 = vsub.f32 %v59_v1, %v77_v19  ;;  %v81_v23 = vsub.f32 %v61_v3, %v77_v19 }
  0x21   :  { %v143_v2 = vperm.slane %v141_v63, 0 }
  0x22   :  { %v82_v24 = vmul.f32 %v78_v20, %v78_v20  ;;  %v84_v25 = vmul.f32 %v80_v21, %v80_v21  ;;  %v83_v26 = vmul.f32 %v79_v22, %v79_v22  ;;  %v85_v27 = vmul.f32 %v81_v23, %v81_v23 }
  0x24   :  { %v86_v28 = vadd.f32 %v84_v25, %v82_v24  ;;  %v93_v29 = vadd.f32 %v85_v27, %v83_v26 }
  0x26   :  { %v87_v30 = vrot.slane %v86_v28, 4  ;;  %v94_v31 = vrot.slane %v93_v29, 4 }
  0x28   :  { %v88_v32 = vadd.f32 %v87_v30, %v86_v28  ;;  %v95_v33 = vadd.f32 %v94_v31, %v93_v29 }
  0x2a   :  { %v89_v34 = vrot.slane %v88_v32, 2  ;;  %v96_v35 = vrot.slane %v95_v33, 2 }
  0x2c   :  { %v90_v36 = vadd.f32 %v89_v34, %v88_v32  ;;  %v97_v37 = vadd.f32 %v96_v35, %v95_v33 }
  0x2e   :  { %v91_v38 = vrot.slane %v90_v36, 1  ;;  %v98_v39 = vrot.slane %v97_v37, 1 }
  0x30   :  { %v92_v40 = vadd.f32 %v91_v38, %v90_v36  ;;  %v99_v41 = vadd.f32 %v98_v39, %v97_v37 }
  0x32   :  { %v100_v42 = vmul.f32 0.0625, %v92_v40  ;;  %v101_v43 = vmul.f32 0.0625, %v99_v41 }
  0x34   :  { %v102_v44 = vadd.f32 1e-05, %v100_v42  ;;  %v103_v45 = vadd.f32 1e-05, %v101_v43 }
  0x36   :  { %181 = vrsqrt.f32 %v102_v44  ;;  %vm110_vm0 = vweird.f32 %v102_v44  ;;  %vm120_vm2 = vweird.f32 %v103_v45 }
  0x37   :  { %183 = vrsqrt.f32 %v103_v45 }
  0x3c   :  { %v182_v46 = vpop.eup %181 }
  0x3d   :  { %v184_v47 = vpop.eup %183  ;;  %v105_v48 = vmul.f32 %v182_v46, %v102_v44  ;;  %vm111_vm1 = vweird.f32 %v182_v46 }
  0x3e   :  { %v115_v49 = vmul.f32 %v184_v47, %v103_v45  ;;  %vm121_vm3 = vweird.f32 %v184_v47  ;;  %vm112_vm4 = vmor %vm110_vm0, %vm111_vm1 }
  0x3f   :  { %v106_v50 = vmul.f32 %v182_v46, %v105_v48  ;;  %vm122_vm5 = vmor %vm120_vm2, %vm121_vm3 }
  0x40   :  { %v116_v51 = vmul.f32 %v184_v47, %v115_v49 }
  0x41   :  { %v107_v52 = vmul.f32 0.5, %v106_v50 }
  0x42   :  { %v117_v53 = vmul.f32 0.5, %v116_v51 }
  0x43   :  { %v108_v54 = vsub.f32 1.5, %v107_v52 }
  0x44   :  { %v118_v55 = vsub.f32 1.5, %v117_v53 }
  0x45   :  { %v109_v56 = vmul.f32 %v182_v46, %v108_v54 }
  0x46   :  { %v119_v57 = vmul.f32 %v184_v47, %v118_v55 }
  0x47   :  { %v113_v58 = vsel %vm112_vm4, %v182_v46, %v109_v56 }
  0x48   :  { %v123_v59 = vsel %vm122_vm5, %v184_v47, %v119_v57 }
  0x49   :  { %v127_v61 = vrot.slane %v123_v59, 7 }
  0x4b   :  { %v129_v62 = vsel %vm128_vm6, %v113_v58, %v127_v61 }
  0x4c   :  { %v131_v0 = vmul.f32 %v129_v62, %v124_v60 }
  0x4e   :  { %v133_v1 = vperm.slane %v131_v0, 0  ;;  %v134_v3 = vperm.slane %v131_v0, 1 }
  0x50   :  { %v137_v5 = vmul.f32 %v133_v1, %v78_v20  ;;  %v138_v6 = vmul.f32 %v134_v3, %v79_v22  ;;  %v139_v7 = vmul.f32 %v133_v1, %v80_v21  ;;  %v140_v8 = vmul.f32 %v134_v3, %v81_v23 }
  0x52   :  { %v147_v9 = vadd.f32 %v143_v2, %v137_v5  ;;  %v148_v10 = vadd.f32 %v144_v4, %v138_v6  ;;  %v149_v11 = vadd.f32 %v143_v2, %v139_v7  ;;  %v150_v12 = vadd.f32 %v144_v4, %v140_v8 }
  0x54   :  { %151 = vst [vmem:[#allocation8] sm:$0xff] %v147_v9 }
  0x55   :  { %152 = vst [vmem:[#allocation8 + $0x8] sm:$0xff] %v148_v10 }
  0x56   :  { %153 = vst [vmem:[#allocation8 + $0x10] sm:$0xff] %v149_v11 }
  0x57   :  { %154 = vst [vmem:[#allocation8 + $0x18] sm:$0xff] %v150_v12 }
  0x58   :  { %167 = dma.vmem_to_hbm [thread:$0]  %s160_s2, 512, %s162_s30, [#allocation4], %s289_s22, %s289_s22, %s290_s23  }
  0x59   :  { %285 = dma.done.wait [#allocation4], 512  }
  0x5a   :  { %286 = vsyncadd [#allocation4], 4294966784 }
  0x5b   :  { %172 = vsyncpa [#allocation3], 1 }
  0x5c   :  { %173 = vsyncpa [#allocation6], 1 }
  0x5d   :  { %174 = vsyncpa [#allocation4], 1 }

</bundles_post_ra>
